<compile_context>
chip_gen: v5e
topology: v5e:2x2
jax: 0.10.0
libtpu: 0.0.40
codegen_flags: <defaults>
</compile_context>

<pallas_src>
import jax
import jax.numpy as jnp
from jax.experimental import pallas as pl
from jax.experimental.pallas import tpu as pltpu

IN_FEATURES = 1000
HIDDEN = 256
OUT_FEATURES = 101
OUT_PAD = 128   # 101 -> 128 lanes: unmasked, lane-dense output stores


def _fcnet_kernel(x_ref, w1_ref, b1_ref, alpha_ref, w2_ref, b2_ref, o_ref):
    # x arrives untouched from HBM (no wrapper pad/cast); cast to bf16 on the
    # VPU right before feeding the MXU. Rows beyond B in a partial last block
    # are undefined but only influence output rows that Pallas masks off.
    x = x_ref[...].astype(jnp.bfloat16)
    # fc1: (tb, 1000) bf16 @ (1000, 256) bf16 -> f32 accumulate on the MXU.
    h = jnp.dot(x, w1_ref[...], preferred_element_type=jnp.float32)
    h = h + b1_ref[...]
    # PReLU with a single shared slope parameter (PyTorch default, init 0.25),
    # computed in f32 on the VPU.
    alpha = alpha_ref[0, 0]
    h = jnp.where(h > 0, h, alpha * h)
    # fc2: (tb, 256) bf16 @ (256, 128) bf16 -> f32.
    out = jnp.dot(h.astype(jnp.bfloat16), w2_ref[...],
                  preferred_element_type=jnp.float32)
    o_ref[...] = out + b2_ref[...]


def prepare_params(params):
    """One-time parameter prep (do NOT run per forward call).

    Casts weights to bf16, lane-pads the 101-wide output dim to 128, and
    reshapes biases / PReLU slope for the kernel.
    """
    w1 = params["w1"].astype(jnp.bfloat16)                            # (1000, 256)
    b1 = params["b1"].astype(jnp.float32).reshape(1, HIDDEN)          # (1, 256)
    w2 = jnp.pad(params["w2"].astype(jnp.float32),
                 ((0, 0), (0, OUT_PAD - OUT_FEATURES))).astype(jnp.bfloat16)
    b2 = jnp.pad(params["b2"].astype(jnp.float32),
                 (0, OUT_PAD - OUT_FEATURES)).reshape(1, OUT_PAD)
    alpha = params["alpha"].astype(jnp.float32).reshape(1, 1)
    return {"w1": w1, "b1": b1, "alpha": alpha, "w2": w2, "b2": b2}


def fcnet_forward(x, prepared, *, batch_tile=512):
    """x: (B, 1000) (or any (B, ...) flattening to 1000). Returns (B, 101) f32.

    prepared: output of prepare_params (padded bf16 weights, f32 biases).
    batch_tile: rows per grid step. 512 (multiple of 8) amortizes the ~0.35 us
    per-step overhead on every TPU generation (v5e included — the 128-wide v5e
    MXU does not constrain the batch tile); 1024 also fits VMEM comfortably.
    For B > 8 the tile is additionally capped near B/2 so the grid has >= 2
    steps and both v7x TensorCores get work.
    """
    w1, b1, alpha, w2, b2 = (prepared["w1"], prepared["b1"], prepared["alpha"],
                             prepared["w2"], prepared["b2"])
    B = x.shape[0]
    # Mirror x.view(x.size(0), -1); keep the caller's dtype (cast in-kernel).
    x = x.reshape(B, -1)

    if B <= 8:
        # Single block covering the whole (tiny) batch: block dims equal the
        # full array dims, so no (8,128) padding is needed.
        tb = B
    else:
        # Multiple of 8, at most batch_tile, and small enough that the grid
        # has at least 2 steps (v7x megacore sharding via "parallel").
        tb = min(batch_tile, pl.cdiv(pl.cdiv(B, 2), 8) * 8)
    grid = (pl.cdiv(B, tb),)

    cost = pl.CostEstimate(
        flops=2 * B * (IN_FEATURES * HIDDEN + HIDDEN * OUT_PAD),
        transcendentals=0,
        bytes_accessed=(x.size * x.dtype.itemsize            # x (as given)
                        + w1.size * 2 + w2.size * 2           # weights (bf16)
                        + b1.size * 4 + b2.size * 4           # biases (f32)
                        + B * OUT_PAD * 4),                   # output (f32)
    )

    out_pad = pl.pallas_call(
        _fcnet_kernel,
        out_shape=jax.ShapeDtypeStruct((B, OUT_PAD), jnp.float32),
        grid_spec=pltpu.PrefetchScalarGridSpec(
            num_scalar_prefetch=0,
            grid=grid,
            in_specs=[
                # x tile: last dim equals full array dim (1000) -> legal, no pad.
                pl.BlockSpec((tb, IN_FEATURES), lambda i: (i, 0)),
                # Weights/biases: constant index_map -> fetched once, VMEM-resident.
                pl.BlockSpec((IN_FEATURES, HIDDEN), lambda i: (0, 0)),   # w1
                pl.BlockSpec((1, HIDDEN), lambda i: (0, 0)),             # b1
                pl.BlockSpec((1, 1), lambda i: (0, 0),
                             memory_space=pltpu.SMEM),                   # prelu alpha
                pl.BlockSpec((HIDDEN, OUT_PAD), lambda i: (0, 0)),       # w2
                pl.BlockSpec((1, OUT_PAD), lambda i: (0, 0)),            # b2
            ],
            # Lane-dense (tb, 128) output block -> unmasked full-lane stores.
            out_specs=pl.BlockSpec((tb, OUT_PAD), lambda i: (i, 0)),
        ),
        compiler_params=pltpu.CompilerParams(
            dimension_semantics=("parallel",)),
        cost_estimate=cost,
    )(x, w1, b1, alpha, w2, b2)

    # Drop the output-feature padding (101 of 128 lanes are real).
    return out_pad[:, :OUT_FEATURES]


def init_params(key):
    """Deterministic synthetic parameters matching fcNet's shapes.

    Weights stored as (in, out) = transpose of PyTorch nn.Linear's (out, in).
    PReLU slope initialized to 0.25 like PyTorch's default.
    """
    k1, k2, k3, k4 = jax.random.split(key, 4)
    bound1 = 1.0 / jnp.sqrt(IN_FEATURES)
    bound2 = 1.0 / jnp.sqrt(HIDDEN)
    w1 = jax.random.uniform(k1, (IN_FEATURES, HIDDEN), jnp.float32,
                            -bound1, bound1)
    b1 = jax.random.uniform(k2, (HIDDEN,), jnp.float32, -bound1, bound1)
    w2 = jax.random.uniform(k3, (HIDDEN, OUT_FEATURES), jnp.float32,
                            -bound2, bound2)
    b2 = jax.random.uniform(k4, (OUT_FEATURES,), jnp.float32, -bound2, bound2)
    alpha = jnp.array([0.25], jnp.float32)
    return {"w1": w1, "b1": b1, "alpha": alpha, "w2": w2, "b2": b2}


def reference_forward(x, params):
    """Pure-JAX f32 reference for verification."""
    x = x.reshape(x.shape[0], -1).astype(jnp.float32)
    h = x @ params["w1"] + params["b1"]
    a = params["alpha"][0]
    h = jnp.where(h > 0, h, a * h)
    return h @ params["w2"] + params["b2"]


if __name__ == "__main__":
    key = jax.random.PRNGKey(0)
    pkey, xkey = jax.random.split(key)
    params = init_params(pkey)
    prepared = prepare_params(params)          # one-time prep, out of hot path

    B = 2
    x = jax.random.normal(xkey, (B, IN_FEATURES), jnp.float32)

    out = fcnet_forward(x, prepared)
    out = jax.block_until_ready(out)

    ref = reference_forward(x, params)
    assert out.shape == (B, OUT_FEATURES), out.shape
    # bf16 matmul inputs (f32 accumulation) -> looser tolerance than pure f32.
    assert jnp.allclose(out, ref, atol=2e-2, rtol=2e-2), \
        float(jnp.max(jnp.abs(out - ref)))

    print("KERNEL_OK")
</pallas_src>

<mosaic_0001>
module attributes {stable_mosaic.version = 11 : i64} {
  func.func @_fcnet_kernel(%arg0: i32, %arg1: memref<2x1000xf32, #tpu.memory_space<vmem>>, %arg2: memref<1000x256xbf16, #tpu.memory_space<vmem>>, %arg3: memref<1x256xf32, #tpu.memory_space<vmem>>, %arg4: memref<1x1xf32, #tpu.memory_space<smem>>, %arg5: memref<256x128xbf16, #tpu.memory_space<vmem>>, %arg6: memref<1x128xf32, #tpu.memory_space<vmem>>, %arg7: memref<2x128xf32, #tpu.memory_space<vmem>>) attributes {dimension_semantics = [#tpu.dimension_semantics<parallel>], iteration_bounds = array<i64: 1>, scalar_prefetch = 0 : i64, scratch_operands = 0 : i64, tpu.core_type = #tpu.core_type<tc>, window_params = [{transform_indices = @transform_0, window_bounds = array<i64: 2, 1000>}, {pipeline_mode = #tpu.pipeline_mode<synchronous>, transform_indices = @transform_1, window_bounds = array<i64: 1000, 256>}, {pipeline_mode = #tpu.pipeline_mode<synchronous>, transform_indices = @transform_2, window_bounds = array<i64: 1, 256>}, {transform_indices = @transform_3, window_bounds = array<i64: 1, 1>}, {pipeline_mode = #tpu.pipeline_mode<synchronous>, transform_indices = @transform_4, window_bounds = array<i64: 256, 128>}, {pipeline_mode = #tpu.pipeline_mode<synchronous>, transform_indices = @transform_5, window_bounds = array<i64: 1, 128>}, {transform_indices = @transform_6, window_bounds = array<i64: 2, 128>}]} {
    %c0 = arith.constant 0 : index
    %c0_0 = arith.constant 0 : index
    %0 = vector.load %arg1[%c0, %c0_0] : memref<2x1000xf32, #tpu.memory_space<vmem>>, vector<2x1000xf32>
    %1 = arith.truncf %0 : vector<2x1000xf32> to vector<2x1000xbf16>
    %c0_1 = arith.constant 0 : index
    %c0_2 = arith.constant 0 : index
    %2 = vector.load %arg2[%c0_1, %c0_2] : memref<1000x256xbf16, #tpu.memory_space<vmem>>, vector<1000x256xbf16>
    %cst = arith.constant dense<0.000000e+00> : vector<2x256xf32>
    %3 = tpu.matmul %1, %2, %cst {dimension_numbers = #tpu.dot_dimension_numbers<[1], [0], [0], [1], [0, 0, 1, 1], [], []>} : vector<2x1000xbf16>, vector<1000x256xbf16>, vector<2x256xf32> -> vector<2x256xf32>
    %c0_3 = arith.constant 0 : index
    %c0_4 = arith.constant 0 : index
    %4 = vector.load %arg3[%c0_3, %c0_4] : memref<1x256xf32, #tpu.memory_space<vmem>>, vector<1x256xf32>
    %5 = vector.broadcast %4 : vector<1x256xf32> to vector<2x256xf32>
    %6 = arith.addf %3, %5 : vector<2x256xf32>
    %c0_5 = arith.constant 0 : index
    %c0_6 = arith.constant 0 : index
    %7 = memref.load %arg4[%c0_5, %c0_6] : memref<1x1xf32, #tpu.memory_space<smem>>
    %cst_7 = arith.constant 0.000000e+00 : f32
    %8 = vector.broadcast %cst_7 : f32 to vector<2x256xf32>
    %9 = arith.cmpf ogt, %6, %8 : vector<2x256xf32>
    %10 = vector.broadcast %7 : f32 to vector<2x256xf32>
    %11 = arith.mulf %10, %6 : vector<2x256xf32>
    %12 = arith.select %9, %6, %11 : vector<2x256xi1>, vector<2x256xf32>
    %13 = arith.truncf %12 : vector<2x256xf32> to vector<2x256xbf16>
    %c0_8 = arith.constant 0 : index
    %c0_9 = arith.constant 0 : index
    %14 = vector.load %arg5[%c0_8, %c0_9] : memref<256x128xbf16, #tpu.memory_space<vmem>>, vector<256x128xbf16>
    %cst_10 = arith.constant dense<0.000000e+00> : vector<2x128xf32>
    %15 = tpu.matmul %13, %14, %cst_10 {dimension_numbers = #tpu.dot_dimension_numbers<[1], [0], [0], [1], [0, 0, 1, 1], [], []>} : vector<2x256xbf16>, vector<256x128xbf16>, vector<2x128xf32> -> vector<2x128xf32>
    %c0_11 = arith.constant 0 : index
    %c0_12 = arith.constant 0 : index
    %16 = vector.load %arg6[%c0_11, %c0_12] : memref<1x128xf32, #tpu.memory_space<vmem>>, vector<1x128xf32>
    %17 = vector.broadcast %16 : vector<1x128xf32> to vector<2x128xf32>
    %18 = arith.addf %15, %17 : vector<2x128xf32>
    %c0_13 = arith.constant 0 : index
    %c0_14 = arith.constant 0 : index
    %19 = vector.load %arg7[%c0_13, %c0_14] : memref<2x128xf32, #tpu.memory_space<vmem>>, vector<2x128xf32>
    tpu.vector_store %arg7[%c0_13, %c0_14], %18 {strides = array<i32>} : memref<2x128xf32, #tpu.memory_space<vmem>>, vector<2x128xf32>,
    return
  }
  func.func @transform_0(%arg0: i32) -> (i32, i32) {
    %c0_i32 = arith.constant 0 : i32
    %c0_i32_0 = arith.constant 0 : i32
    return %arg0, %c0_i32 : i32, i32
  }
  func.func @transform_1(%arg0: i32) -> (i32, i32) {
    %c0_i32 = arith.constant 0 : i32
    %c0_i32_0 = arith.constant 0 : i32
    %c0_i32_1 = arith.constant 0 : i32
    return %c0_i32, %c0_i32_0 : i32, i32
  }
  func.func @transform_2(%arg0: i32) -> (i32, i32) {
    %c0_i32 = arith.constant 0 : i32
    %c0_i32_0 = arith.constant 0 : i32
    %c0_i32_1 = arith.constant 0 : i32
    return %c0_i32, %c0_i32_0 : i32, i32
  }
  func.func @transform_3(%arg0: i32) -> (i32, i32) {
    %c0_i32 = arith.constant 0 : i32
    %c0_i32_0 = arith.constant 0 : i32
    %c0_i32_1 = arith.constant 0 : i32
    return %c0_i32, %c0_i32_0 : i32, i32
  }
  func.func @transform_4(%arg0: i32) -> (i32, i32) {
    %c0_i32 = arith.constant 0 : i32
    %c0_i32_0 = arith.constant 0 : i32
    %c0_i32_1 = arith.constant 0 : i32
    return %c0_i32, %c0_i32_0 : i32, i32
  }
  func.func @transform_5(%arg0: i32) -> (i32, i32) {
    %c0_i32 = arith.constant 0 : i32
    %c0_i32_0 = arith.constant 0 : i32
    %c0_i32_1 = arith.constant 0 : i32
    return %c0_i32, %c0_i32_0 : i32, i32
  }
  func.func @transform_6(%arg0: i32) -> (i32, i32) {
    %c0_i32 = arith.constant 0 : i32
    %c0_i32_0 = arith.constant 0 : i32
    return %arg0, %c0_i32 : i32, i32
  }
}

</mosaic_0001>

<bundles_post_ra>
// kernel: tpu_custom_call.1
= control target key start
LH: loop header
LB: loop body
LE: loop exit
PB: predicated region body
PF: predicated region fallthrough
CT: control target
= control target key end

     0   :  { %12 = vsyncpa [#allocation4], 0  ;;  %s2181_s0 = inlined_call_operand.hbm [shape: f32[2,1000], index: 0, kind: input, shape index: {}]   ;;  %s2182_s1 = inlined_call_operand.hbm [shape: bf16[1000,256], index: 1, kind: input, shape index: {}]   ;;  %s2183_s2 = inlined_call_operand.vmem [shape: f32[1,256], index: 2, kind: input, shape index: {}]   ;;  %s2184_s3 = inlined_call_operand.<no memory space> [shape: f32[1,1], index: 3, kind: input, shape index: {}]   ;;  %s2185_s4 = inlined_call_operand.hbm [shape: bf16[256,128], index: 4, kind: input, shape index: {}]   ;;  %s2186_s5 = inlined_call_operand.vmem [shape: f32[1,128], index: 5, kind: input, shape index: {}]   ;;  %s2187_s6 = inlined_call_operand.hbm [shape: f32[2,128], index: 6, kind: output, shape index: {}]  }
   0x1   :  { %13 = vsyncpa [#allocation7], 0  ;;  %s30_s23 = sshll.u32 %s2182_s1, 4  ;;  %s31_s23 = int_to_ptr.hbm [resolvable:$true] %s30_s23 }
   0x2   :  { %14 = vsyncpa [#allocation5], 0  ;;  %s2077_s24 = smov [#allocation6]   ;;  %s20_s28 = sshll.u32 %s2181_s0, 4  ;;  %s21_s28 = int_to_ptr.hbm [resolvable:$true] %s20_s28 }
   0x3   :  { %s32_s25 = sshll.u32 %s2077_s24, 4  ;;  %s2078_s29 = smov 128   ;;  %s33_s25 = int_to_ptr.vmem [resolvable:$true] %s32_s25 }
   0x4   :  { %s2079_s30 = smov 8   ;;  %s2080_s7 = smov [#allocation3]  }
   0x5   :  { %38 = dma.hbm_to_vmem [thread:$0]  %s31_s23, 16000, %s33_s25, [#allocation7], %s2078_s29, %s2078_s29, %s2079_s30  }
   0x6   :  { %s22_s8 = sshll.u32 %s2080_s7, 4  ;;  %s47_s11 = sshll.u32 %s2185_s4, 4  ;;  %s23_s8 = int_to_ptr.vmem [resolvable:$true] %s22_s8  ;;  %s48_s11 = int_to_ptr.hbm [resolvable:$true] %s47_s11 }
   0x7   :  { %25 = dma.hbm_to_vmem [thread:$0]  %s21_s28, 256, %s23_s8, [#allocation4]  }
   0x8   :  { %s2081_s1 = smov [#allocation8]   ;;  %s2082_s13 = smov 64  }
   0x9   :  { %s49_s12 = sshll.u32 %s2081_s1, 4  ;;  %s2083_s14 = smov 4   ;;  %s50_s12 = int_to_ptr.vmem [resolvable:$true] %s49_s12 }
   0xa   :  { %55 = dma.hbm_to_vmem [thread:$0]  %s48_s11, 2048, %s50_s12, [#allocation7], %s2082_s13, %s2082_s13, %s2083_s14  }
   0xb   :  { %2071 = dma.done.wait [#allocation4], 256  }
   0xc   :  { %2072 = vsyncadd [#allocation4], 4294967040 }
   0xd   :  { %2073 = dma.done.wait [#allocation7], 18048  }
   0xe   :  { %2074 = vsyncadd [#allocation7], 4294949248  ;;  %v1322_v0 = vld [vmem:[#allocation6 + $0x70] sm:$0xf]  ;;  %v1841_v1 = vld [vmem:[#allocation6 + $0x74] sm:$0xf0] }
   0xf   :  { %v1386_v2 = vld [vmem:[#allocation6 + $0xf0] sm:$0xf]  ;;  %v1323_v3 = vor.u32 %v1841_v1, %v1322_v0  ;;  %v1857_v4 = vld [vmem:[#allocation6 + $0xf4] sm:$0xf0]  ;;  %v1314_v11 = vld [vmem:[#allocation6 + $0x60] sm:$0xf] }
  0x10   :  { %v1450_v5 = vld [vmem:[#allocation6 + $0x170] sm:$0xf]  ;;  %v1873_v6 = vld [vmem:[#allocation6 + $0x174] sm:$0xf0]  ;;  %v1387_v7 = vor.u32 %v1857_v4, %v1386_v2  ;;  %v1839_v13 = vld [vmem:[#allocation6 + $0x64] sm:$0xf0] }
  0x11   :  { %v1451_v8 = vor.u32 %v1873_v6, %v1450_v5  ;;  %v1514_v9 = vld [vmem:[#allocation6 + $0x1f0] sm:$0xf]  ;;  %v1889_v10 = vld [vmem:[#allocation6 + $0x1f4] sm:$0xf0]  ;;  %869 = vmatpush.bf16.msra.mxu0 %v1323_v3  ;;  %v1378_v14 = vld [vmem:[#allocation6 + $0xe0] sm:$0xf]  ;;  %v1315_v16 = vor.u32 %v1839_v13, %v1314_v11 }
  0x12   :  { %v1515_v12 = vor.u32 %v1889_v10, %v1514_v9  ;;  %v1855_v15 = vld [vmem:[#allocation6 + $0xe4] sm:$0xf0]  ;;  %882 = vmatpush.bf16.msra.mxu1 %v1387_v7  ;;  %v1442_v18 = vld [vmem:[#allocation6 + $0x160] sm:$0xf]  ;;  %v1306_v23 = vld [vmem:[#allocation6 + $0x50] sm:$0xf] }
  0x13   :  { %895 = vmatpush.bf16.msra.mxu2 %v1451_v8  ;;  %v1379_v17 = vor.u32 %v1855_v15, %v1378_v14  ;;  %v1871_v19 = vld [vmem:[#allocation6 + $0x164] sm:$0xf0]  ;;  %v1506_v20 = vld [vmem:[#allocation6 + $0x1e0] sm:$0xf]  ;;  %v1837_v24 = vld [vmem:[#allocation6 + $0x54] sm:$0xf0] }
  0x14   :  { %908 = vmatpush.bf16.msra.mxu3 %v1515_v12  ;;  %v1443_v21 = vor.u32 %v1871_v19, %v1442_v18  ;;  %v1887_v22 = vld [vmem:[#allocation6 + $0x1e4] sm:$0xf0]  ;;  %v1370_v26 = vld [vmem:[#allocation6 + $0xd0] sm:$0xf]  ;;  %v1853_v27 = vld [vmem:[#allocation6 + $0xd4] sm:$0xf0]  ;;  %v1307_v29 = vor.u32 %v1837_v24, %v1306_v23 }
  0x15   :  { %v1507_v25 = vor.u32 %v1887_v22, %v1506_v20  ;;  %v1434_v28 = vld [vmem:[#allocation6 + $0x150] sm:$0xf]  ;;  %870 = vmatpush.bf16.msra.mxu0 %v1315_v16  ;;  %v1869_v30 = vld [vmem:[#allocation6 + $0x154] sm:$0xf0]  ;;  %v1371_v33 = vor.u32 %v1853_v27, %v1370_v26  ;;  %v1298_v35 = vld [vmem:[#allocation6 + $0x40] sm:$0xf] }
  0x16   :  { %v1498_v31 = vld [vmem:[#allocation6 + $0x1d0] sm:$0xf]  ;;  %v1885_v32 = vld [vmem:[#allocation6 + $0x1d4] sm:$0xf0]  ;;  %883 = vmatpush.bf16.msra.mxu1 %v1379_v17  ;;  %v1435_v34 = vor.u32 %v1869_v30, %v1434_v28  ;;  %v1835_v36 = vld [vmem:[#allocation6 + $0x44] sm:$0xf0] }
  0x17   :  { %896 = vmatpush.bf16.msra.mxu2 %v1443_v21  ;;  %v1362_v37 = vld [vmem:[#allocation6 + $0xc0] sm:$0xf]  ;;  %v1499_v38 = vor.u32 %v1885_v32, %v1498_v31  ;;  %v1851_v39 = vld [vmem:[#allocation6 + $0xc4] sm:$0xf0]  ;;  %v1299_v44 = vor.u32 %v1835_v36, %v1298_v35  ;;  %v1290_v47 = vld [vmem:[#allocation6 + $0x30] sm:$0xf] }
  0x18   :  { %909 = vmatpush.bf16.msra.mxu3 %v1507_v25  ;;  %v1426_v40 = vld [vmem:[#allocation6 + $0x140] sm:$0xf]  ;;  %v1867_v41 = vld [vmem:[#allocation6 + $0x144] sm:$0xf0]  ;;  %v1363_v45 = vor.u32 %v1851_v39, %v1362_v37  ;;  %v1833_v48 = vld [vmem:[#allocation6 + $0x34] sm:$0xf0] }
  0x19   :  { %v1490_v42 = vld [vmem:[#allocation6 + $0x1c0] sm:$0xf]  ;;  %v1883_v43 = vld [vmem:[#allocation6 + $0x1c4] sm:$0xf0]  ;;  %871 = vmatpush.bf16.msra.mxu0 %v1307_v29  ;;  %v1427_v46 = vor.u32 %v1867_v41, %v1426_v40  ;;  %v1354_v49 = vld [vmem:[#allocation6 + $0xb0] sm:$0xf]  ;;  %v1291_v56 = vor.u32 %v1833_v48, %v1290_v47 }
  0x1a   :  { %884 = vmatpush.bf16.msra.mxu1 %v1371_v33  ;;  %v1491_v50 = vor.u32 %v1883_v43, %v1490_v42  ;;  %v1849_v51 = vld [vmem:[#allocation6 + $0xb4] sm:$0xf0]  ;;  %v1418_v52 = vld [vmem:[#allocation6 + $0x130] sm:$0xf]  ;;  %v1282_v59 = vld [vmem:[#allocation6 + $0x20] sm:$0xf] }
  0x1b   :  { %897 = vmatpush.bf16.msra.mxu2 %v1435_v34  ;;  %v1865_v53 = vld [vmem:[#allocation6 + $0x134] sm:$0xf0]  ;;  %v1482_v54 = vld [vmem:[#allocation6 + $0x1b0] sm:$0xf]  ;;  %v1355_v57 = vor.u32 %v1849_v51, %v1354_v49  ;;  %v1831_v60 = vld [vmem:[#allocation6 + $0x24] sm:$0xf0] }
  0x1c   :  { %910 = vmatpush.bf16.msra.mxu3 %v1499_v38  ;;  %v1881_v55 = vld [vmem:[#allocation6 + $0x1b4] sm:$0xf0]  ;;  %v1419_v58 = vor.u32 %v1865_v53, %v1418_v52  ;;  %v1346_v61 = vld [vmem:[#allocation6 + $0xa0] sm:$0xf]  ;;  %v1847_v63 = vld [vmem:[#allocation6 + $0xa4] sm:$0xf0]  ;;  %v1283_v4 = vor.u32 %v1831_v60, %v1282_v59 }
  0x1d   :  { %872 = vmatpush.bf16.msra.mxu0 %v1299_v44  ;;  %v1483_v62 = vor.u32 %v1881_v55, %v1482_v54  ;;  %v1410_v0 = vld [vmem:[#allocation6 + $0x120] sm:$0xf]  ;;  %v1863_v1 = vld [vmem:[#allocation6 + $0x124] sm:$0xf0]  ;;  %v1347_v5 = vor.u32 %v1847_v63, %v1346_v61  ;;  %v1274_v7 = vld [vmem:[#allocation6 + $0x10] sm:$0xf] }
  0x1e   :  { %885 = vmatpush.bf16.msra.mxu1 %v1363_v45  ;;  %v1474_v2 = vld [vmem:[#allocation6 + $0x1a0] sm:$0xf]  ;;  %v1879_v3 = vld [vmem:[#allocation6 + $0x1a4] sm:$0xf0]  ;;  %v1411_v6 = vor.u32 %v1863_v1, %v1410_v0  ;;  %v1829_v8 = vld [vmem:[#allocation6 + $0x14] sm:$0xf0] }
  0x1f   :  { %898 = vmatpush.bf16.msra.mxu2 %v1427_v46  ;;  %v1338_v9 = vld [vmem:[#allocation6 + $0x90] sm:$0xf]  ;;  %v1475_v10 = vor.u32 %v1879_v3, %v1474_v2  ;;  %v1845_v11 = vld [vmem:[#allocation6 + $0x94] sm:$0xf0]  ;;  %v1275_v16 = vor.u32 %v1829_v8, %v1274_v7  ;;  %v1266_v17 = vld [vmem:[#allocation6] sm:$0xf] }
  0x20   :  { %911 = vmatpush.bf16.msra.mxu3 %v1491_v50  ;;  %v1402_v12 = vld [vmem:[#allocation6 + $0x110] sm:$0xf]  ;;  %v1861_v13 = vld [vmem:[#allocation6 + $0x114] sm:$0xf0]  ;;  %v1827_v18 = vld [vmem:[#allocation6 + $0x4] sm:$0xf0]  ;;  %v1339_v20 = vor.u32 %v1845_v11, %v1338_v9 }
  0x21   :  { %873 = vmatpush.bf16.msra.mxu0 %v1291_v56  ;;  %v1466_v14 = vld [vmem:[#allocation6 + $0x190] sm:$0xf]  ;;  %v1877_v15 = vld [vmem:[#allocation6 + $0x194] sm:$0xf0]  ;;  %v2129_v19 = vld [vmem:[#allocation6 + $0x3e0] sm:$0xff]  ;;  %v1403_v21 = vor.u32 %v1861_v13, %v1402_v12  ;;  %v1267_v33 = vor.u32 %v1827_v18, %v1266_v17  ;;  %vm862_vm0 = vcmask 1043456  }
  0x22   :  { %886 = vmatpush.bf16.msra.mxu1 %v1355_v57  ;;  %v1330_v22 = vld [vmem:[#allocation6 + $0x80] sm:$0xf]  ;;  %v1843_v23 = vld [vmem:[#allocation6 + $0x84] sm:$0xf0]  ;;  %v606_v25 = vunpack.c.l.b16 %v2129_v19  ;;  %v1467_v26 = vor.u32 %v1877_v15, %v1466_v14  ;;  %v1578_v30 = vld [vmem:[#allocation6 + $0x270] sm:$0xf] }
  0x23   :  { %899 = vmatpush.bf16.msra.mxu2 %v1419_v58  ;;  %v1394_v24 = vld [vmem:[#allocation6 + $0x100] sm:$0xf]  ;;  %v1859_v27 = vld [vmem:[#allocation6 + $0x104] sm:$0xf0]  ;;  %v1905_v31 = vld [vmem:[#allocation6 + $0x274] sm:$0xf0]  ;;  %v1331_v37 = vor.u32 %v1843_v23, %v1330_v22 }
  0x24   :  { %912 = vmatpush.bf16.msra.mxu3 %v1483_v62  ;;  %v1458_v28 = vld [vmem:[#allocation6 + $0x180] sm:$0xf]  ;;  %v1875_v29 = vld [vmem:[#allocation6 + $0x184] sm:$0xf0]  ;;  %v1642_v32 = vld [vmem:[#allocation6 + $0x2f0] sm:$0xf]  ;;  %v1395_v38 = vor.u32 %v1859_v27, %v1394_v24  ;;  %v732_v39 = vpack.c.b16 %v606_v25, %v606_v25  ;;  %v1579_v41 = vor.u32 %v1905_v31, %v1578_v30 }
  0x25   :  { %874 = vmatpush.bf16.msra.mxu0 %v1283_v4  ;;  %v1921_v34 = vld [vmem:[#allocation6 + $0x2f4] sm:$0xf0]  ;;  %v1706_v35 = vld [vmem:[#allocation6 + $0x370] sm:$0xf]  ;;  %v1459_v40 = vor.u32 %v1875_v29, %v1458_v28  ;;  %v1570_v44 = vld [vmem:[#allocation6 + $0x260] sm:$0xf] }
  0x26   :  { %887 = vmatpush.bf16.msra.mxu1 %v1347_v5  ;;  %v1937_v36 = vld [vmem:[#allocation6 + $0x374] sm:$0xf0]  ;;  %v1643_v42 = vor.u32 %v1921_v34, %v1642_v32  ;;  %v1903_v45 = vld [vmem:[#allocation6 + $0x264] sm:$0xf0]  ;;  %v1634_v46 = vld [vmem:[#allocation6 + $0x2e0] sm:$0xf] }
  0x27   :  { %900 = vmatpush.bf16.msra.mxu2 %v1411_v6  ;;  %v1707_v43 = vor.u32 %v1937_v36, %v1706_v35  ;;  %v1919_v47 = vld [vmem:[#allocation6 + $0x2e4] sm:$0xf0]  ;;  %v1698_v48 = vld [vmem:[#allocation6 + $0x360] sm:$0xf]  ;;  %v864_v50 = vsel %vm862_vm0, %v732_v39, 0  ;;  %v71_v53 = vld [vmem:[#allocation3] sm:$0xff]  ;;  %v1571_v54 = vor.u32 %v1903_v45, %v1570_v44 }
  0x28   :  { %913 = vmatpush.bf16.msra.mxu3 %v1475_v10  ;;  %v1935_v49 = vld [vmem:[#allocation6 + $0x364] sm:$0xf0]  ;;  %v1754_v51 = vld [vmem:[#allocation6 + $0x3d0] sm:$0xf]  ;;  %v1949_v52 = vld [vmem:[#allocation6 + $0x3d4] sm:$0xf0]  ;;  %v1635_v55 = vor.u32 %v1919_v47, %v1634_v46 }
  0x29   :  { %875 = vmatpush.bf16.msra.mxu0 %v1275_v16  ;;  %75 = vst [vmem:[#allocation1] ss:$4 sm:$0xff] %v71_v53  ;;  %v1699_v56 = vor.u32 %v1935_v49, %v1698_v48  ;;  %v1562_v57 = vld [vmem:[#allocation6 + $0x250] sm:$0xf]  ;;  %v1901_v58 = vld [vmem:[#allocation6 + $0x254] sm:$0xf0]  ;;  %v1755_v60 = vor.u32 %v1949_v52, %v1754_v51 }
  0x2a   :  { %888 = vmatpush.bf16.msra.mxu1 %v1339_v20  ;;  %v1626_v59 = vld [vmem:[#allocation6 + $0x2d0] sm:$0xf]  ;;  %v1917_v61 = vld [vmem:[#allocation6 + $0x2d4] sm:$0xf0]  ;;  %v1746_v0 = vld [vmem:[#allocation6 + $0x3c0] sm:$0xf]  ;;  %v1563_v2 = vor.u32 %v1901_v58, %v1562_v57 }
  0x2b   :  { %901 = vmatpush.bf16.msra.mxu2 %v1403_v21  ;;  %v1690_v62 = vld [vmem:[#allocation6 + $0x350] sm:$0xf]  ;;  %v1933_v63 = vld [vmem:[#allocation6 + $0x354] sm:$0xf0]  ;;  %v1947_v1 = vld [vmem:[#allocation6 + $0x3c4] sm:$0xf0]  ;;  %v1627_v5 = vor.u32 %v1917_v61, %v1626_v59 }
  0x2c   :  { %914 = vmatpush.bf16.msra.mxu3 %v1467_v26  ;;  %v1554_v3 = vld [vmem:[#allocation6 + $0x240] sm:$0xf]  ;;  %v1899_v4 = vld [vmem:[#allocation6 + $0x244] sm:$0xf0]  ;;  %v1691_v6 = vor.u32 %v1933_v63, %v1690_v62  ;;  %v1747_v10 = vor.u32 %v1947_v1, %v1746_v0  ;;  %v1738_v12 = vld [vmem:[#allocation6 + $0x3b0] sm:$0xf] }
  0x2d   :  { %876 = vmatpush.bf16.msra.mxu0 %v1267_v33  ;;  %v1618_v7 = vld [vmem:[#allocation6 + $0x2c0] sm:$0xf]  ;;  %v1915_v8 = vld [vmem:[#allocation6 + $0x2c4] sm:$0xf0]  ;;  %v1945_v13 = vld [vmem:[#allocation6 + $0x3b4] sm:$0xf0]  ;;  %v1555_v16 = vor.u32 %v1899_v4, %v1554_v3 }
  0x2e   :  { %889 = vmatpush.bf16.msra.mxu1 %v1331_v37  ;;  %v1682_v9 = vld [vmem:[#allocation6 + $0x340] sm:$0xf]  ;;  %v1931_v11 = vld [vmem:[#allocation6 + $0x344] sm:$0xf0]  ;;  %v1619_v17 = vor.u32 %v1915_v8, %v1618_v7  ;;  %v1546_v24 = vld [vmem:[#allocation6 + $0x230] sm:$0xf]  ;;  %v1739_v29 = vor.u32 %v1945_v13, %v1738_v12 }
  0x2f   :  { %902 = vmatpush.bf16.msra.mxu2 %v1395_v38  ;;  %v1683_v23 = vor.u32 %v1931_v11, %v1682_v9  ;;  %v1897_v25 = vld [vmem:[#allocation6 + $0x234] sm:$0xf0]  ;;  %v1610_v26 = vld [vmem:[#allocation6 + $0x2b0] sm:$0xf]  ;;  %v1730_v33 = vld [vmem:[#allocation6 + $0x3a0] sm:$0xf] }
  0x30   :  { %915 = vmatpush.bf16.msra.mxu3 %v1459_v40  ;;  %v80_v14 = vld.sshfl [vmem:[#allocation1 + $0x10] sm:$0xff pattern:$0x73625140]  ;;  %v78_v15 = vld.sshfl [vmem:[#allocation1] sm:$0xff pattern:$0x73625140]  ;;  %v1547_v35 = vor.u32 %v1897_v25, %v1546_v24 }
  0x31   :  { %921 = vmatpush.bf16.msrb.mxu0 %v1579_v41  ;;  %v2133_v18 = vpack.c.bf16 %v80_v14, %v80_v14  ;;  %v2135_v20 = vpack.c.bf16 %v78_v15, %v78_v15  ;;  %v81_v21 = vld.sshfl [vmem:[#allocation1 + $0x18] sm:$0xff pattern:$0x73625140]  ;;  %v79_v22 = vld.sshfl [vmem:[#allocation1 + $0x8] sm:$0xff pattern:$0x73625140] }
  0x32   :  { %934 = vmatpush.bf16.msrb.mxu1 %v1643_v42  ;;  %v2137_v27 = vpack.c.bf16 %v81_v21, %v81_v21  ;;  %v2139_v28 = vpack.c.bf16 %v79_v22, %v79_v22  ;;  %v1913_v30 = vld [vmem:[#allocation6 + $0x2b4] sm:$0xf0]  ;;  %v1674_v31 = vld [vmem:[#allocation6 + $0x330] sm:$0xf]  ;;  %v1943_v34 = vld [vmem:[#allocation6 + $0x3a4] sm:$0xf0] }
  0x33   :  { %947 = vmatpush.bf16.msrb.mxu2 %v1707_v43  ;;  %v1929_v32 = vld [vmem:[#allocation6 + $0x334] sm:$0xf0]  ;;  %877 = vmatmul.bf16.vlgmr.msra.gmra.mxu0 %v2135_v20  ;;  %v1611_v36 = vor.u32 %v1913_v30, %v1610_v26  ;;  %v1538_v38 = vld [vmem:[#allocation6 + $0x220] sm:$0xf]  ;;  %v1895_v39 = vld [vmem:[#allocation6 + $0x224] sm:$0xf0]  ;;  %v1731_v41 = vor.u32 %v1943_v34, %v1730_v33 }
  0x34   :  { %961 = vmatpush.bf16.msrb.mxu3 %v864_v50  ;;  %903 = vmatmul.bf16.vlgmr.msra.gmra.mxu2 %v2133_v18  ;;  %v1675_v37 = vor.u32 %v1929_v32, %v1674_v31  ;;  %v1602_v40 = vld [vmem:[#allocation6 + $0x2a0] sm:$0xf]  ;;  %v1911_v42 = vld [vmem:[#allocation6 + $0x2a4] sm:$0xf0]  ;;  %v1722_v45 = vld [vmem:[#allocation6 + $0x390] sm:$0xf]  ;;  %v1539_v48 = vor.u32 %v1895_v39, %v1538_v38 }
  0x35   :  { %922 = vmatpush.bf16.msrb.mxu0 %v1571_v54  ;;  %916 = vmatmul.bf16.vlgmr.msra.gmra.mxu3 %v2137_v27  ;;  %v1666_v43 = vld [vmem:[#allocation6 + $0x320] sm:$0xf]  ;;  %v1927_v44 = vld [vmem:[#allocation6 + $0x324] sm:$0xf0]  ;;  %v1941_v46 = vld [vmem:[#allocation6 + $0x394] sm:$0xf0]  ;;  %v1603_v49 = vor.u32 %v1911_v42, %v1602_v40 }
  0x36   :  { %935 = vmatpush.bf16.msrb.mxu1 %v1635_v55  ;;  %v72_v47 = vld [vmem:[#allocation3 + $0x8] sm:$0xff]  ;;  %v1667_v50 = vor.u32 %v1927_v44, %v1666_v43  ;;  %v1530_v51 = vld [vmem:[#allocation6 + $0x210] sm:$0xf]  ;;  %v1723_v54 = vor.u32 %v1941_v46, %v1722_v45  ;;  %v1714_v58 = vld [vmem:[#allocation6 + $0x380] sm:$0xf]  ;;  %vm858_vm1 = vcmask 850944  }
  0x37   :  { %948 = vmatpush.bf16.msrb.mxu2 %v1699_v56  ;;  %890 = vmatmul.bf16.vlgmr.msra.gmra.mxu1 %v2139_v28  ;;  %77 = vst [vmem:[#allocation1 + $0x20] ss:$4 sm:$0xff] %v72_v47  ;;  %v1893_v52 = vld [vmem:[#allocation6 + $0x214] sm:$0xf0]  ;;  %v1594_v53 = vld [vmem:[#allocation6 + $0x290] sm:$0xf] }
  0x38   :  { %962 = vmatpush.bf16.msrb.mxu3 %v1755_v60  ;;  %v1909_v55 = vld [vmem:[#allocation6 + $0x294] sm:$0xf0]  ;;  %v1658_v56 = vld [vmem:[#allocation6 + $0x310] sm:$0xf]  ;;  %v1939_v59 = vld [vmem:[#allocation6 + $0x384] sm:$0xf0]  ;;  %v1531_v61 = vor.u32 %v1893_v52, %v1530_v51 }
  0x39   :  { %923 = vmatpush.bf16.msrb.mxu0 %v1563_v2  ;;  %v1925_v57 = vld [vmem:[#allocation6 + $0x314] sm:$0xf0]  ;;  %v1840_v60 = vld [vmem:[#allocation6 + $0x74] sm:$0xf]  ;;  %v1324_v62 = vld [vmem:[#allocation6 + $0x78] sm:$0xf0]  ;;  %v1595_v1 = vor.u32 %v1909_v55, %v1594_v53 }
  0x3a   :  { %936 = vmatpush.bf16.msrb.mxu1 %v1627_v5  ;;  %v1522_v63 = vld [vmem:[#allocation6 + $0x200] sm:$0xf]  ;;  %v1891_v0 = vld [vmem:[#allocation6 + $0x204] sm:$0xf0]  ;;  %v1659_v2 = vor.u32 %v1925_v57, %v1658_v56  ;;  %v1838_v8 = vld [vmem:[#allocation6 + $0x64] sm:$0xf] }
  0x3b   :  { %949 = vmatpush.bf16.msrb.mxu2 %v1691_v6  ;;  %v1586_v3 = vld [vmem:[#allocation6 + $0x280] sm:$0xf]  ;;  %v1907_v4 = vld [vmem:[#allocation6 + $0x284] sm:$0xf0]  ;;  %v1715_v6 = vor.u32 %v1939_v59, %v1714_v58  ;;  %v1856_v9 = vld [vmem:[#allocation6 + $0xf4] sm:$0xf]  ;;  %v1523_v14 = vor.u32 %v1891_v0, %v1522_v63 }
  0x3c   :  { %963 = vmatpush.bf16.msrb.mxu3 %v1747_v10  ;;  %v1650_v5 = vld [vmem:[#allocation6 + $0x300] sm:$0xf]  ;;  %v1923_v7 = vld [vmem:[#allocation6 + $0x304] sm:$0xf0]  ;;  %v1327_v10 = vor.u32 %v1840_v60, %v1324_v62  ;;  %v1388_v11 = vld [vmem:[#allocation6 + $0xf8] sm:$0xf0]  ;;  %v1587_v21 = vor.u32 %v1907_v4, %v1586_v3 }
  0x3d   :  { %924 = vmatpush.bf16.msrb.mxu0 %v1555_v16  ;;  %v1872_v12 = vld [vmem:[#allocation6 + $0x174] sm:$0xf]  ;;  %v1452_v13 = vld [vmem:[#allocation6 + $0x178] sm:$0xf0]  ;;  %v1316_v15 = vld [vmem:[#allocation6 + $0x68] sm:$0xf0]  ;;  %v1651_v22 = vor.u32 %v1923_v7, %v1650_v5  ;;  %v1391_v26 = vor.u32 %v1856_v9, %v1388_v11 }
  0x3e   :  { %937 = vmatpush.bf16.msrb.mxu1 %v1619_v17  ;;  %v1888_v16 = vld [vmem:[#allocation6 + $0x1f4] sm:$0xf]  ;;  %v1516_v17 = vld [vmem:[#allocation6 + $0x1f8] sm:$0xf0]  ;;  %v1854_v25 = vld [vmem:[#allocation6 + $0xe4] sm:$0xf]  ;;  %v1319_v33 = vor.u32 %v1838_v8, %v1316_v15 }
  0x3f   :  { %950 = vmatpush.bf16.msrb.mxu2 %v1683_v23  ;;  %v84_v23 = vld.sshfl [vmem:[#allocation1 + $0x30] sm:$0xff pattern:$0x73625140]  ;;  %v82_v24 = vld.sshfl [vmem:[#allocation1 + $0x20] sm:$0xff pattern:$0x73625140]  ;;  %v1519_v34 = vor.u32 %v1888_v16, %v1516_v17 }
  0x40   :  { %964 = vmatpush.bf16.msrb.mxu3 %v1739_v29  ;;  %v1455_v29 = vor.u32 %v1872_v12, %v1452_v13  ;;  %v85_v30 = vld.sshfl [vmem:[#allocation1 + $0x38] sm:$0xff pattern:$0x73625140]  ;;  %v1836_v31 = vld [vmem:[#allocation6 + $0x54] sm:$0xf]  ;;  %v2145_v38 = vpack.c.bf16 %v84_v23, %v84_v23  ;;  %v2147_v39 = vpack.c.bf16 %v82_v24, %v82_v24  ;;  %s2084_s17 = smov [#allocation9]  }
  0x41   :  { %925 = vmatpush.bf16.msrb.mxu0 %v1547_v35  ;;  %v83_v32 = vld.sshfl [vmem:[#allocation1 + $0x28] sm:$0xff pattern:$0x73625140]  ;;  %v1380_v35 = vld [vmem:[#allocation6 + $0xe8] sm:$0xf0]  ;;  %v2149_v43 = vpack.c.bf16 %v85_v30, %v85_v30  ;;  %s1251_s18 = sshll.u32 %s2084_s17, 4  ;;  %s1252_s18 = int_to_ptr.vmem [resolvable:$true] %s1251_s18 }
  0x42   :  { %938 = vmatpush.bf16.msrb.mxu1 %v1611_v36  ;;  %v1870_v36 = vld [vmem:[#allocation6 + $0x164] sm:$0xf]  ;;  %v1308_v40 = vld [vmem:[#allocation6 + $0x58] sm:$0xf0]  ;;  %v1508_v42 = vld [vmem:[#allocation6 + $0x1e8] sm:$0xf0]  ;;  %v2151_v44 = vpack.c.bf16 %v83_v32, %v83_v32  ;;  %v1383_v45 = vor.u32 %v1854_v25, %v1380_v35 }
  0x43   :  { %951 = vmatpush.bf16.msrb.mxu2 %v1675_v37  ;;  %v1444_v37 = vld [vmem:[#allocation6 + $0x168] sm:$0xf0]  ;;  %v1834_v47 = vld [vmem:[#allocation6 + $0x44] sm:$0xf]  ;;  %v1372_v51 = vld [vmem:[#allocation6 + $0xd8] sm:$0xf0] }
  0x44   :  { %965 = vmatpush.bf16.msrb.mxu3 %v1731_v41  ;;  %v1886_v41 = vld [vmem:[#allocation6 + $0x1e4] sm:$0xf]  ;;  %v1447_v46 = vor.u32 %v1870_v36, %v1444_v37  ;;  %v1868_v52 = vld [vmem:[#allocation6 + $0x154] sm:$0xf]  ;;  %v1436_v53 = vld [vmem:[#allocation6 + $0x158] sm:$0xf0] }
  0x45   :  { %926 = vmatpush.bf16.msrb.mxu0 %v1539_v48  ;;  %v1852_v48 = vld [vmem:[#allocation6 + $0xd4] sm:$0xf]  ;;  %v1500_v56 = vld [vmem:[#allocation6 + $0x1d8] sm:$0xf0]  ;;  %v1439_v58 = vor.u32 %v1868_v52, %v1436_v53  ;;  %v1850_v60 = vld [vmem:[#allocation6 + $0xc4] sm:$0xf]  ;;  %v607_v52 = vunpack.c.h.b16 %v2129_v19 }
  0x46   :  { %939 = vmatpush.bf16.msrb.mxu1 %v1603_v49  ;;  %v1311_v49 = vor.u32 %v1836_v31, %v1308_v40  ;;  %v1884_v55 = vld [vmem:[#allocation6 + $0x1d4] sm:$0xf]  ;;  %v1375_v57 = vor.u32 %v1852_v48, %v1372_v51  ;;  %v1364_v63 = vld [vmem:[#allocation6 + $0xc8] sm:$0xf0]  ;;  %v1866_v0 = vld [vmem:[#allocation6 + $0x144] sm:$0xf] }
  0x47   :  { %952 = vmatpush.bf16.msrb.mxu2 %v1667_v50  ;;  %v1511_v50 = vor.u32 %v1886_v41, %v1508_v42  ;;  %v1832_v59 = vld [vmem:[#allocation6 + $0x34] sm:$0xf]  ;;  %v1503_v62 = vor.u32 %v1884_v55, %v1500_v56  ;;  %v1882_v3 = vld [vmem:[#allocation6 + $0x1c4] sm:$0xf]  ;;  %v1492_v4 = vld [vmem:[#allocation6 + $0x1c8] sm:$0xf0]  ;;  %v1367_v5 = vor.u32 %v1850_v60, %v1364_v63 }
  0x48   :  { %966 = vmatpush.bf16.msrb.mxu3 %v1723_v54  ;;  %v1300_v54 = vld [vmem:[#allocation6 + $0x48] sm:$0xf0]  ;;  %v1830_v7 = vld [vmem:[#allocation6 + $0x24] sm:$0xf]  ;;  %v1848_v8 = vld [vmem:[#allocation6 + $0xb4] sm:$0xf] }
  0x49   :  { %927 = vmatpush.bf16.msrb.mxu0 %v1531_v61  ;;  %v1303_v61 = vor.u32 %v1834_v47, %v1300_v54  ;;  %v1356_v11 = vld [vmem:[#allocation6 + $0xb8] sm:$0xf0]  ;;  %v1864_v12 = vld [vmem:[#allocation6 + $0x134] sm:$0xf]  ;;  %v1846_v23 = vld [vmem:[#allocation6 + $0xa4] sm:$0xf] }
  0x4a   :  { %940 = vmatpush.bf16.msrb.mxu1 %v1595_v1  ;;  %v1428_v1 = vld [vmem:[#allocation6 + $0x148] sm:$0xf0]  ;;  %v1420_v13 = vld [vmem:[#allocation6 + $0x138] sm:$0xf0]  ;;  %v1880_v15 = vld [vmem:[#allocation6 + $0x1b4] sm:$0xf]  ;;  %v1359_v17 = vor.u32 %v1848_v8, %v1356_v11 }
  0x4b   :  { %953 = vmatpush.bf16.msrb.mxu2 %v1659_v2  ;;  %v1292_v2 = vld [vmem:[#allocation6 + $0x38] sm:$0xf0]  ;;  %v1412_v30 = vld [vmem:[#allocation6 + $0x128] sm:$0xf0]  ;;  %v1878_v32 = vld [vmem:[#allocation6 + $0x1a4] sm:$0xf] }
  0x4c   :  { %967 = vmatpush.bf16.msrb.mxu3 %v1715_v6  ;;  %v1431_v6 = vor.u32 %v1866_v0, %v1428_v1  ;;  %v1295_v9 = vor.u32 %v1832_v59, %v1292_v2  ;;  %v1484_v16 = vld [vmem:[#allocation6 + $0x1b8] sm:$0xf0]  ;;  %v1826_v36 = vld [vmem:[#allocation6 + $0x4] sm:$0xf]  ;;  %v1844_v37 = vld [vmem:[#allocation6 + $0x94] sm:$0xf] }
  0x4d   :  { %928 = vmatpush.bf16.msrb.mxu0 %v1523_v14  ;;  %v1284_v14 = vld [vmem:[#allocation6 + $0x28] sm:$0xf0]  ;;  %v1487_v25 = vor.u32 %v1880_v15, %v1484_v16  ;;  %v1276_v31 = vld [vmem:[#allocation6 + $0x18] sm:$0xf0]  ;;  %v1876_v48 = vld [vmem:[#allocation6 + $0x194] sm:$0xf] }
  0x4e   :  { %941 = vmatpush.bf16.msrb.mxu1 %v1587_v21  ;;  %v1423_v21 = vor.u32 %v1864_v12, %v1420_v13  ;;  %v1287_v24 = vor.u32 %v1830_v7, %v1284_v14  ;;  %v1340_v42 = vld [vmem:[#allocation6 + $0x98] sm:$0xf0]  ;;  %v1268_v47 = vld [vmem:[#allocation6 + $0x8] sm:$0xf0]  ;;  %v1842_v55 = vld [vmem:[#allocation6 + $0x84] sm:$0xf] }
  0x4f   :  { %954 = vmatpush.bf16.msrb.mxu2 %v1651_v22  ;;  %1760 = vmatmul.msk.bf16.vlgmr.msrb.gmra.mxu3 %vm858_vm1, %v2149_v43  ;;  %v1828_v22 = vld [vmem:[#allocation6 + $0x14] sm:$0xf]  ;;  %v1580_v51 = vld [vmem:[#allocation6 + $0x278] sm:$0xf0]  ;;  %v1343_v53 = vor.u32 %v1844_v37, %v1340_v42  ;;  %v1332_v56 = vld [vmem:[#allocation6 + $0x88] sm:$0xf0] }
  0x50   :  { %973 = vmatpush.bf16.msra.mxu3 %v1327_v10  ;;  %929 = vmatmul.bf16.vlgmr.msrb.gmra.mxu0 %v2147_v39  ;;  %v1495_v10 = vor.u32 %v1882_v3, %v1492_v4  ;;  %v1279_v40 = vor.u32 %v1828_v22, %v1276_v31  ;;  %v1396_v60 = vld [vmem:[#allocation6 + $0x108] sm:$0xf0]  ;;  %v1902_v0 = vld [vmem:[#allocation6 + $0x264] sm:$0xf]  ;;  %v1920_v1 = vld [vmem:[#allocation6 + $0x2f4] sm:$0xf] }
  0x51   :  { %986 = vmatpush.bf16.msra.mxu0 %v1391_v26  ;;  %942 = vmatmul.bf16.vlgmr.msrb.gmra.mxu1 %v2151_v44  ;;  %v1348_v26 = vld [vmem:[#allocation6 + $0xa8] sm:$0xf0]  ;;  %v1644_v2 = vld [vmem:[#allocation6 + $0x2f8] sm:$0xf0]  ;;  %v1936_v19 = vld [vmem:[#allocation6 + $0x374] sm:$0xf] }
  0x52   :  { %999 = vmatpush.bf16.msra.mxu1 %v1455_v29  ;;  %955 = vmatmul.bf16.vlgmr.msrb.gmra.mxu2 %v2145_v38  ;;  %v1862_v29 = vld [vmem:[#allocation6 + $0x124] sm:$0xf]  ;;  %v1572_v3 = vld [vmem:[#allocation6 + $0x268] sm:$0xf0]  ;;  %v1708_v4 = vld [vmem:[#allocation6 + $0x378] sm:$0xf0] }
  0x53   :  { %1012 = vmatpush.bf16.msra.mxu2 %v1519_v34  ;;  %v1351_v34 = vor.u32 %v1846_v23, %v1348_v26  ;;  %v1415_v35 = vor.u32 %v1862_v29, %v1412_v30  ;;  %v1711_v11 = vor.u32 %v1936_v19, %v1708_v4  ;;  %v1900_v12 = vld [vmem:[#allocation6 + $0x254] sm:$0xf]  ;;  %v1918_v13 = vld [vmem:[#allocation6 + $0x2e4] sm:$0xf]  ;;  %v1636_v14 = vld [vmem:[#allocation6 + $0x2e8] sm:$0xf0] }
  0x54   :  { %974 = vmatpush.bf16.msra.mxu3 %v1319_v33  ;;  %v1476_v33 = vld [vmem:[#allocation6 + $0x1a8] sm:$0xf0]  ;;  %v1564_v15 = vld [vmem:[#allocation6 + $0x258] sm:$0xf0]  ;;  %v1934_v16 = vld [vmem:[#allocation6 + $0x364] sm:$0xf] }
  0x55   :  { %987 = vmatpush.bf16.msra.mxu0 %v1383_v45  ;;  %v1479_v41 = vor.u32 %v1878_v32, %v1476_v33  ;;  %v1860_v45 = vld [vmem:[#allocation6 + $0x114] sm:$0xf]  ;;  %v1756_v23 = vld [vmem:[#allocation6 + $0x3d8] sm:$0xf0]  ;;  %v1898_v29 = vld [vmem:[#allocation6 + $0x244] sm:$0xf] }
  0x56   :  { %1000 = vmatpush.bf16.msra.mxu1 %v1447_v46  ;;  %v1404_v46 = vld [vmem:[#allocation6 + $0x118] sm:$0xf0]  ;;  %v1948_v22 = vld [vmem:[#allocation6 + $0x3d4] sm:$0xf]  ;;  %v1556_v33 = vld [vmem:[#allocation6 + $0x248] sm:$0xf0] }
  0x57   :  { %1013 = vmatpush.bf16.msra.mxu2 %v1511_v50  ;;  %v1904_v50 = vld [vmem:[#allocation6 + $0x274] sm:$0xf]  ;;  %v1407_v54 = vor.u32 %v1860_v45, %v1404_v46  ;;  %v1628_v31 = vld [vmem:[#allocation6 + $0x2d8] sm:$0xf0]  ;;  %v1759_v32 = vor.u32 %v1948_v22, %v1756_v23  ;;  %v1748_v37 = vld [vmem:[#allocation6 + $0x3c8] sm:$0xf0] }
  0x58   :  { %975 = vmatpush.bf16.msra.mxu3 %v1311_v49  ;;  %v1468_v49 = vld [vmem:[#allocation6 + $0x198] sm:$0xf0]  ;;  %v1583_v63 = vor.u32 %v1904_v50, %v1580_v51  ;;  %v1916_v30 = vld [vmem:[#allocation6 + $0x2d4] sm:$0xf]  ;;  %v1620_v46 = vld [vmem:[#allocation6 + $0x2c8] sm:$0xf0] }
  0x59   :  { %988 = vmatpush.bf16.msra.mxu0 %v1375_v57  ;;  %v1858_v57 = vld [vmem:[#allocation6 + $0x104] sm:$0xf]  ;;  %v1471_v59 = vor.u32 %v1876_v48, %v1468_v49  ;;  %v1896_v45 = vld [vmem:[#allocation6 + $0x234] sm:$0xf]  ;;  %v1548_v48 = vld [vmem:[#allocation6 + $0x238] sm:$0xf0] }
  0x5a   :  { %1001 = vmatpush.bf16.msra.mxu1 %v1439_v58  ;;  %v1271_v58 = vor.u32 %v1826_v36, %v1268_v47  ;;  %v1399_v7 = vor.u32 %v1858_v57, %v1396_v60  ;;  %v1946_v36 = vld [vmem:[#allocation6 + $0x3c4] sm:$0xf]  ;;  %v1684_v50 = vld [vmem:[#allocation6 + $0x348] sm:$0xf0]  ;;  %v1944_v51 = vld [vmem:[#allocation6 + $0x3b4] sm:$0xf] }
  0x5b   :  { %1014 = vmatpush.bf16.msra.mxu2 %v1503_v62  ;;  %v1460_v62 = vld [vmem:[#allocation6 + $0x188] sm:$0xf0]  ;;  %v1751_v47 = vor.u32 %v1946_v36, %v1748_v37  ;;  %v1930_v49 = vld [vmem:[#allocation6 + $0x344] sm:$0xf]  ;;  %v1532_v4 = vld [vmem:[#allocation6 + $0x218] sm:$0xf0] }
  0x5c   :  { %976 = vmatpush.bf16.msra.mxu3 %v1303_v61  ;;  %v1874_v61 = vld [vmem:[#allocation6 + $0x184] sm:$0xf]  ;;  %v1540_v57 = vld [vmem:[#allocation6 + $0x228] sm:$0xf0]  ;;  %v1956_v37 = vld [vmem:[#allocation8 + $0x30] sm:$0xff]  ;;  %s1253_s21 = sshll.u32 %s2187_s6, 4  ;;  %s1254_s21 = int_to_ptr.hbm [resolvable:$true] %s1253_s21 }
  0x5d   :  { %989 = vmatpush.bf16.msra.mxu0 %v1367_v5  ;;  %v733_v5 = vpack.c.b16 %v607_v52, %v607_v52  ;;  %v1463_v8 = vor.u32 %v1874_v61, %v1460_v62  ;;  %v1551_v52 = vor.u32 %v1896_v45, %v1548_v48  ;;  %v1942_v60 = vld [vmem:[#allocation6 + $0x3a4] sm:$0xf]  ;;  %v1732_v61 = vld [vmem:[#allocation6 + $0x3a8] sm:$0xf0]  ;;  %v1952_v45 = vld [vmem:[#allocation8 + $0x10] sm:$0xff] }
  0x5e   :  { %1002 = vmatpush.bf16.msra.mxu1 %v1431_v6  ;;  %v1335_v6 = vor.u32 %v1842_v55, %v1332_v56  ;;  %v1612_v55 = vld [vmem:[#allocation6 + $0x2b8] sm:$0xf0]  ;;  %v1735_v19 = vor.u32 %v1942_v60, %v1732_v61  ;;  %v1938_v22 = vld [vmem:[#allocation6 + $0x384] sm:$0xf]  ;;  %v1716_v23 = vld [vmem:[#allocation6 + $0x388] sm:$0xf0]  ;;  %v1080_v61 = vstv %s2184_s3 }
  0x5f   :  { %1015 = vmatpush.bf16.msra.mxu2 %v1495_v10  ;;  %v1575_v10 = vor.u32 %v1902_v0, %v1572_v3  ;;  %v1604_v3 = vld [vmem:[#allocation6 + $0x2a8] sm:$0xf0] }
  0x60   :  { %977 = vmatpush.bf16.msra.mxu3 %v1295_v9  ;;  %v1647_v9 = vor.u32 %v1920_v1, %v1644_v2  ;;  %v1892_v1 = vld [vmem:[#allocation6 + $0x214] sm:$0xf]  ;;  %v1910_v2 = vld [vmem:[#allocation6 + $0x2a4] sm:$0xf] }
  0x61   :  { %990 = vmatpush.bf16.msra.mxu0 %v1359_v17  ;;  %v1700_v17 = vld [vmem:[#allocation6 + $0x368] sm:$0xf0] }
  0x62   :  { %1003 = vmatpush.bf16.msra.mxu1 %v1423_v21  ;;  %v867_v21 = vsel %vm862_vm0, %v733_v5, 0  ;;  %v1703_v26 = vor.u32 %v1934_v16, %v1700_v17  ;;  %v1926_v5 = vld [vmem:[#allocation6 + $0x324] sm:$0xf]  ;;  %v1524_v16 = vld [vmem:[#allocation6 + $0x208] sm:$0xf0] }
  0x63   :  { %1016 = vmatpush.bf16.msra.mxu2 %v1487_v25  ;;  %v1567_v25 = vor.u32 %v1900_v12, %v1564_v15  ;;  %v1890_v12 = vld [vmem:[#allocation6 + $0x204] sm:$0xf]  ;;  %v1924_v17 = vld [vmem:[#allocation6 + $0x314] sm:$0xf] }
  0x64   :  { %978 = vmatpush.bf16.msra.mxu3 %v1287_v24  ;;  %v1639_v24 = vor.u32 %v1918_v13, %v1636_v14  ;;  %v1908_v13 = vld [vmem:[#allocation6 + $0x294] sm:$0xf]  ;;  %v1596_v14 = vld [vmem:[#allocation6 + $0x298] sm:$0xf0] }
  0x65   :  { %991 = vmatpush.bf16.msra.mxu0 %v1351_v34  ;;  %v1932_v34 = vld [vmem:[#allocation6 + $0x354] sm:$0xf] }
  0x66   :  { %1004 = vmatpush.bf16.msra.mxu1 %v1415_v35  ;;  %v1692_v35 = vld [vmem:[#allocation6 + $0x358] sm:$0xf0] }
  0x67   :  { %1017 = vmatpush.bf16.msra.mxu2 %v1479_v41  ;;  %v1559_v41 = vor.u32 %v1898_v29, %v1556_v33  ;;  %v1695_v42 = vor.u32 %v1932_v34, %v1692_v35  ;;  %v1906_v29 = vld [vmem:[#allocation6 + $0x284] sm:$0xf]  ;;  %v1652_v33 = vld [vmem:[#allocation6 + $0x308] sm:$0xf0] }
  0x68   :  { %979 = vmatpush.bf16.msra.mxu3 %v1279_v40  ;;  %v1631_v40 = vor.u32 %v1916_v30, %v1628_v31  ;;  %v1588_v30 = vld [vmem:[#allocation6 + $0x288] sm:$0xf0]  ;;  %v1719_v31 = vor.u32 %v1938_v22, %v1716_v23  ;;  %v1957_v34 = vld [vmem:[#allocation8 + $0x38] sm:$0xff] }
  0x69   :  { %992 = vmatpush.bf16.msra.mxu0 %v1343_v53  ;;  %v1894_v53 = vld [vmem:[#allocation6 + $0x224] sm:$0xf]  ;;  %v1591_v35 = vor.u32 %v1906_v29, %v1588_v30 }
  0x6a   :  { %1005 = vmatpush.bf16.msra.mxu1 %v1407_v54  ;;  %v1912_v54 = vld [vmem:[#allocation6 + $0x2b4] sm:$0xf] }
  0x6b   :  { %1018 = vmatpush.bf16.msra.mxu2 %v1471_v59  ;;  %v1676_v59 = vld [vmem:[#allocation6 + $0x338] sm:$0xf0]  ;;  %v1615_v62 = vor.u32 %v1912_v54, %v1612_v55 }
  0x6c   :  { %980 = vmatpush.bf16.msra.mxu3 %v1271_v58  ;;  %v1928_v58 = vld [vmem:[#allocation6 + $0x334] sm:$0xf] }
  0x6d   :  { %993 = vmatpush.bf16.msra.mxu0 %v1335_v6  ;;  %v1679_v0 = vor.u32 %v1928_v58, %v1676_v59  ;;  %v1668_v6 = vld [vmem:[#allocation6 + $0x328] sm:$0xf0] }
  0x6e   :  { %1006 = vmatpush.bf16.msra.mxu1 %v1399_v7  ;;  %v1940_v7 = vld [vmem:[#allocation6 + $0x394] sm:$0xf] }
  0x6f   :  { %1019 = vmatpush.bf16.msra.mxu2 %v1463_v8  ;;  %981 = vmatmul.bf16.vlgmr.msra.gmra.mxu3 %v2135_v20  ;;  %v1914_v20 = vld [vmem:[#allocation6 + $0x2c4] sm:$0xf]  ;;  %v1724_v8 = vld [vmem:[#allocation6 + $0x398] sm:$0xf0] }
  0x70   :  { %1025 = vmatpush.bf16.msrb.mxu3 %v1583_v63  ;;  %994 = vmatmul.bf16.vlgmr.msra.gmra.mxu0 %v2139_v28  ;;  %v1623_v28 = vor.u32 %v1914_v20, %v1620_v46  ;;  %v1543_v63 = vor.u32 %v1894_v53, %v1540_v57  ;;  %v1727_v15 = vor.u32 %v1940_v7, %v1724_v8  ;;  %v1963_v7 = vld [vmem:[#allocation8 + $0x68] sm:$0xff]  ;;  %v1962_v8 = vld [vmem:[#allocation8 + $0x60] sm:$0xff] }
  0x71   :  { %1038 = vmatpush.bf16.msrb.mxu0 %v1647_v9  ;;  %1007 = vmatmul.bf16.vlgmr.msra.gmra.mxu1 %v2133_v18  ;;  %v1687_v18 = vor.u32 %v1930_v49, %v1684_v50  ;;  %v1607_v9 = vor.u32 %v1910_v2, %v1604_v3  ;;  %v1964_v3 = vld [vmem:[#allocation8 + $0x70] sm:$0xff] }
  0x72   :  { %1051 = vmatpush.bf16.msrb.mxu1 %v1711_v11  ;;  %1020 = vmatmul.bf16.vlgmr.msra.gmra.mxu2 %v2137_v27  ;;  %v1740_v27 = vld [vmem:[#allocation6 + $0x3b8] sm:$0xf0]  ;;  %v1671_v11 = vor.u32 %v1926_v5, %v1668_v6 }
  0x73   :  { %1065 = vmatpush.bf16.msrb.mxu2 %v867_v21  ;;  %v1743_v56 = vor.u32 %v1944_v51, %v1740_v27  ;;  %v1660_v21 = vld [vmem:[#allocation6 + $0x318] sm:$0xf0] }
  0x74   :  { %1026 = vmatpush.bf16.msrb.mxu3 %v1575_v10  ;;  %v1535_v10 = vor.u32 %v1892_v1, %v1532_v4  ;;  %v1965_v1 = vld [vmem:[#allocation8 + $0x78] sm:$0xff] }
  0x75   :  { %1039 = vmatpush.bf16.msrb.mxu0 %v1639_v24  ;;  %v1599_v24 = vor.u32 %v1908_v13, %v1596_v14  ;;  %v1959_v14 = vld [vmem:[#allocation8 + $0x48] sm:$0xff] }
  0x76   :  { %1052 = vmatpush.bf16.msrb.mxu1 %v1703_v26  ;;  %v1663_v26 = vor.u32 %v1924_v17, %v1660_v21  ;;  %v1958_v21 = vld [vmem:[#allocation8 + $0x40] sm:$0xff] }
  0x77   :  { %1066 = vmatpush.bf16.msrb.mxu2 %v1759_v32  ;;  %v1922_v32 = vld [vmem:[#allocation6 + $0x304] sm:$0xf] }
  0x78   :  { %1027 = vmatpush.bf16.msrb.mxu3 %v1567_v25  ;;  %v1527_v25 = vor.u32 %v1890_v12, %v1524_v16  ;;  %v1655_v36 = vor.u32 %v1922_v32, %v1652_v33  ;;  %v1960_v12 = vld [vmem:[#allocation8 + $0x50] sm:$0xff] }
  0x79   :  { %1040 = vmatpush.bf16.msrb.mxu0 %v1631_v40  ;;  %v1955_v40 = vld [vmem:[#allocation8 + $0x28] sm:$0xff] }
  0x7a   :  { %1053 = vmatpush.bf16.msrb.mxu1 %v1695_v42  ;;  %v1953_v42 = vld [vmem:[#allocation8 + $0x18] sm:$0xff] }
  0x7b   :  { %1067 = vmatpush.bf16.msrb.mxu2 %v1751_v47 }
  0x7c   :  { %1028 = vmatpush.bf16.msrb.mxu3 %v1559_v41  ;;  %v1954_v41 = vld [vmem:[#allocation8 + $0x20] sm:$0xff] }
  0x7d   :  { %1041 = vmatpush.bf16.msrb.mxu0 %v1623_v28 }
  0x7e   :  { %1054 = vmatpush.bf16.msrb.mxu1 %v1687_v18 }
  0x7f   :  { %1068 = vmatpush.bf16.msrb.mxu2 %v1743_v56 }
  0x80   :  { %1029 = vmatpush.bf16.msrb.mxu3 %v1551_v52 }
  0x81   :  { %1042 = vmatpush.bf16.msrb.mxu0 %v1615_v62 }
  0x82   :  { %1055 = vmatpush.bf16.msrb.mxu1 %v1679_v0 }
  0x83   :  { %1069 = vmatpush.bf16.msrb.mxu2 %v1735_v19 }
  0x84   :  { %1030 = vmatpush.bf16.msrb.mxu3 %v1543_v63 }
  0x85   :  { %1043 = vmatpush.bf16.msrb.mxu0 %v1607_v9  ;;  %v1961_v9 = vld [vmem:[#allocation8 + $0x58] sm:$0xff] }
  0x86   :  { %1056 = vmatpush.bf16.msrb.mxu1 %v1671_v11 }
  0x87   :  { %1070 = vmatpush.bf16.msrb.mxu2 %v1727_v15 }
  0x88   :  { %1031 = vmatpush.bf16.msrb.mxu3 %v1535_v10 }
  0x89   :  { %1044 = vmatpush.bf16.msrb.mxu0 %v1599_v24 }
  0x8a   :  { %1057 = vmatpush.bf16.msrb.mxu1 %v1663_v26 }
  0x8b   :  { %1071 = vmatpush.bf16.msrb.mxu2 %v1719_v31 }
  0x8c   :  { %1032 = vmatpush.bf16.msrb.mxu3 %v1527_v25 }
  0x8d   :  { %1045 = vmatpush.bf16.msrb.mxu0 %v1591_v35 }
  0x8e   :  { %1761 = vmatmul.msk.bf16.vlgmr.msrb.gmra.mxu2 %vm858_vm1, %v2149_v43  ;;  %1058 = vmatpush.bf16.msrb.mxu1 %v1655_v36  ;;  %v227_v43 = vld [vmem:[%s2183_s2] sm:$0x3] }
  0x8f   :  { %1219 = vmatpush.bf16.msra.mxu2 %v1957_v34  ;;  %1033 = vmatmul.bf16.vlgmr.msrb.gmra.mxu3 %v2147_v39  ;;  %v1951_v39 = vld [vmem:[#allocation8 + $0x8] sm:$0xff]  ;;  %v229_v46 = vperm.slane %v227_v43, 0  ;;  %v230_v23 = vperm.slane %v227_v43, 1 }
  0x90   :  { %1046 = vmatmul.bf16.vlgmr.msrb.gmra.mxu0 %v2151_v44  ;;  %1232 = vmatpush.bf16.msra.mxu3 %v1965_v1 }
  0x91   :  { %1059 = vmatmul.bf16.vlgmr.msrb.gmra.mxu1 %v2145_v38  ;;  %v1950_v38 = vld [vmem:[#allocation8] sm:$0xff] }
  0x93   :  { %1220 = vmatpush.bf16.msra.mxu2 %v1956_v37 }
  0x94   :  { %1233 = vmatpush.bf16.msra.mxu3 %v1964_v3 }
  0x97   :  { %1221 = vmatpush.bf16.msra.mxu2 %v1955_v40 }
  0x98   :  { %1234 = vmatpush.bf16.msra.mxu3 %v1963_v7 }
  0x9b   :  { %1222 = vmatpush.bf16.msra.mxu2 %v1954_v41 }
  0x9c   :  { %1235 = vmatpush.bf16.msra.mxu3 %v1962_v8 }
  0x9f   :  { %1223 = vmatpush.bf16.msra.mxu2 %v1953_v42 }
  0xa0   :  { %1236 = vmatpush.bf16.msra.mxu3 %v1961_v9 }
  0xa3   :  { %1224 = vmatpush.bf16.msra.mxu2 %v1952_v45 }
  0xa4   :  { %1237 = vmatpush.bf16.msra.mxu3 %v1960_v12 }
  0xa7   :  { %1225 = vmatpush.bf16.msra.mxu2 %v1951_v39 }
  0xa8   :  { %1238 = vmatpush.bf16.msra.mxu3 %v1959_v14 }
  0xab   :  { %1226 = vmatpush.bf16.msra.mxu2 %v1950_v38 }
  0xac   :  { %1239 = vmatpush.bf16.msra.mxu3 %v1958_v21 }
  0xb0   :  { %v878_v20 = vpop.f32.mrf.mxu0 }
  0xb1   :  { %v879_v48 = vadd.f32 %v878_v20, %v229_v46 }
  0xb4   :  { %v891_v44 = vpop.f32.mrf.mxu1 }
  0xb5   :  { %v892_v27 = vadd.f32 %v891_v44, %v879_v48 }
  0xb7   :  { %v904_v47 = vpop.f32.mrf.mxu2 }
  0xb8   :  { %v917_v49 = vpop.f32.mrf.mxu3  ;;  %v880_v50 = vpop.f32.mrf.mxu0  ;;  %v905_v52 = vadd.f32 %v904_v47, %v892_v27  ;;  %v1974_v47 = vld [vmem:[%s2186_s5] ss:$0 sm:$0xff] }
  0xba   :  { %v918_v53 = vadd.f32 %v917_v49, %v905_v52 }
  0xbc   :  { %v893_v51 = vpop.f32.mrf.mxu1 }
  0xbf   :  { %v906_v28 = vpop.f32.mrf.mxu2 }
  0xc0   :  { %v919_v18 = vpop.f32.mrf.mxu3 }
  0xcd   :  { %v930_v54 = vpop.f32.mrf.mxu0 }
  0xce   :  { %v931_v55 = vadd.f32 %v930_v54, %v918_v53  ;;  %v943_v56 = vpop.f32.mrf.mxu1 }
  0xd0   :  { %v944_v57 = vadd.f32 %v943_v56, %v931_v55 }
  0xd2   :  { %v969_v60 = vpop.f32.mrf.mxu3 }
  0xd5   :  { %v956_v58 = vpop.f32.mrf.mxu2  ;;  %v932_v62 = vpop.f32.mrf.mxu0 }
  0xd6   :  { %v957_v59 = vadd.f32 %v956_v58, %v944_v57  ;;  %v945_v0 = vpop.f32.mrf.mxu1 }
  0xd8   :  { %v970_v63 = vadd.f32 %v969_v60, %v957_v59 }
  0xda   :  { %vm1078_vm2 = vcmp.gt.f32.partialorder %v970_v63, 0.0  ;;  %v1081_v2 = vmul.f32 %v1080_v61, %v970_v63  ;;  %v971_v6 = vpop.f32.mrf.mxu3 }
  0xdc   :  { %v1083_v19 = vsel %vm1078_vm2, %v970_v63, %v1081_v2 }
  0xdd   :  { %v1085_v4 = vpack.c.bf16 %v1083_v19, %v1083_v19  ;;  %v958_v5 = vpop.f32.mrf.mxu2 }
  0xdf   :  { %1227 = vmatmul.bf16.vlgmr.msra.gmra.mxu2 %v1085_v4 }
  0xed   :  { %v995_v10 = vpop.f32.mrf.mxu0 }
  0xee   :  { %v1008_v11 = vpop.f32.mrf.mxu1 }
  0xf2   :  { %v982_v13 = vpop.f32.mrf.mxu3 }
  0xf3   :  { %v983_v25 = vadd.f32 %v982_v13, %v230_v23 }
  0xf5   :  { %v1021_v15 = vpop.f32.mrf.mxu2  ;;  %v997_v16 = vpop.f32.mrf.mxu0  ;;  %v996_v26 = vadd.f32 %v995_v10, %v983_v25 }
  0xf6   :  { %v1010_v17 = vpop.f32.mrf.mxu1 }
  0xf7   :  { %v1009_v29 = vadd.f32 %v1008_v11, %v996_v26 }
  0xf9   :  { %v1022_v32 = vadd.f32 %v1021_v15, %v1009_v29 }
  0xfa   :  { %v984_v22 = vpop.f32.mrf.mxu3 }
  0xfd   :  { %v1023_v24 = vpop.f32.mrf.mxu2 }
 0x10d   :  { %v1047_v30 = vpop.f32.mrf.mxu0 }
 0x10e   :  { %v1060_v31 = vpop.f32.mrf.mxu1 }
 0x111   :  { %v1073_v35 = vpop.f32.mrf.mxu2 }
 0x112   :  { %v1034_v33 = vpop.f32.mrf.mxu3 }
 0x113   :  { %v1035_v34 = vadd.f32 %v1034_v33, %v1022_v32 }
 0x115   :  { %v1048_v36 = vadd.f32 %v1047_v30, %v1035_v34  ;;  %v1049_v40 = vpop.f32.mrf.mxu0 }
 0x116   :  { %v1062_v41 = vpop.f32.mrf.mxu1 }
 0x117   :  { %v1061_v37 = vadd.f32 %v1060_v31, %v1048_v36 }
 0x119   :  { %v1074_v42 = vadd.f32 %v1073_v35, %v1061_v37  ;;  %v1075_v20 = vpop.f32.mrf.mxu2 }
 0x11a   :  { %v1036_v45 = vpop.f32.mrf.mxu3 }
 0x11b   :  { %vm1079_vm3 = vcmp.gt.f32.partialorder %v1074_v42, 0.0  ;;  %v1082_v39 = vmul.f32 %v1080_v61, %v1074_v42 }
 0x11d   :  { %v1084_v43 = vsel %vm1079_vm3, %v1074_v42, %v1082_v39 }
 0x11e   :  { %v1086_v44 = vpack.c.bf16 %v1084_v43, %v1084_v43 }
 0x120   :  { %1240 = vmatmul.bf16.vlgmr.msra.gmra.mxu3 %v1086_v44 }
 0x162   :  { %v1228_v46 = vpop.f32.mrf.mxu2 }
 0x163   :  { %v1229_v48 = vadd.f32 %v1974_v47, %v1228_v46 }
 0x16a   :  { %v1230_v38 = vpop.f32.mrf.mxu2 }
 0x1a3   :  { %v1241_v49 = vpop.f32.mrf.mxu3 }
 0x1a4   :  { %v1242_v50 = vadd.f32 %v1241_v49, %v1229_v48 }
 0x1a6   :  { %1245 = vst [vmem:[#allocation9] sm:$0x3] %v1242_v50 }
 0x1a7   :  { %1256 = dma.vmem_to_hbm [thread:$0]  %s1252_s18, 32, %s1254_s21, [#allocation5]  }
 0x1ab   :  { %v1243_v51 = vpop.f32.mrf.mxu3 }
 0x1ac   :  { %2075 = dma.done.wait [#allocation5], 32  }
 0x1ad   :  { %2076 = vsyncadd [#allocation5], 4294967264 }
 0x1ae   :  { %1261 = vsyncpa [#allocation4], 1 }
 0x1af   :  { %1262 = vsyncpa [#allocation7], 1 }
 0x1b0   :  { %1263 = vsyncpa [#allocation5], 1 }

</bundles_post_ra>
